<compile_context>
chip_gen: v5e
topology: v5e:2x2
jax: 0.10.0
libtpu: 0.0.40
codegen_flags: <defaults>
</compile_context>

<pallas_src>
import jax
import jax.numpy as jnp
from jax import lax
from jax.experimental import pallas as pl
from jax.experimental.pallas import tpu as pltpu


# ---------------------------------------------------------------------------
# Small synthetic BertConfig
# ---------------------------------------------------------------------------
VOCAB_SIZE = 512
HIDDEN = 128
MAX_POS = 64
PAD_TOKEN_ID = 0
LAYER_NORM_EPS = 1e-12

BATCH = 2
SEQ = 8


def _round_up(x, m):
    return ((x + m - 1) // m) * m


def _bert_embeddings_kernel(ids_ref,                 # (B, S_pad) int32, SMEM (scalar prefetch)
                            wtab_hbm,                # (V, H) f32, HBM (pl.ANY)
                            pos_ref,                 # (T, H) f32, VMEM (auto-pipelined slab)
                            gamma_ref, beta_ref,     # (1, H) f32, VMEM
                            o_ref,                   # (T, H) output tile
                            wbuf, wsem):             # (2T, H) VMEM, DMA sems (2,)
    T, H = o_ref.shape
    b = pl.program_id(0)
    t = pl.program_id(1)
    num_t = pl.num_programs(1)
    slot = t % 2

    def issue_rows(t_idx, dst_slot):
        # One (1, H) row gather per token; all T copies signal the SAME DMA
        # semaphore so a single full-slab wait retires the lot.
        # TODO(synk): at production T (128-256) move this into a
        # lax.fori_loop(..., unroll=8) to bound code size.
        col0 = t_idx * T
        row0 = dst_slot * T
        for i in range(T):
            tok = ids_ref[b, col0 + i]
            pltpu.make_async_copy(
                wtab_hbm.at[pl.ds(tok, 1), :],
                wbuf.at[pl.ds(row0 + i, 1), :],
                wsem.at[dst_slot],
            ).start()

    # First seq-tile of this batch row: nobody prefetched for us.
    @pl.when(t == 0)
    def _():
        issue_rows(0, 0)

    # Prefetch the NEXT seq-tile's word rows into the other slot so their
    # gather latency hides behind this tile's LayerNorm + output writeback.
    # Prefetch never crosses a batch row, so megacore sharding of the
    # "parallel" batch axis is safe (each core owns whole rows).
    @pl.when(t + 1 < num_t)
    def _():
        issue_rows(t + 1, 1 - slot)

    # Single collapsed wait: descriptor covers the whole (T, H) slab for this
    # slot; its byte count equals the sum of the T row copies issued above.
    row0 = pl.multiple_of(slot * T, 8)
    slab = wbuf.at[pl.ds(row0, T), :]
    pltpu.make_async_copy(slab, slab, wsem.at[slot]).wait()

    # ---- word + position embeddings, LayerNorm over the hidden dim. -------
    x = wbuf[pl.ds(row0, T), :] + pos_ref[...]               # (T, H) f32

    inv_h = jnp.float32(1.0 / H)
    mean = jnp.sum(x, axis=-1, keepdims=True) * inv_h
    d = x - mean
    var = jnp.sum(d * d, axis=-1, keepdims=True) * inv_h     # two-pass form
    scale = lax.rsqrt(var + LAYER_NORM_EPS) * gamma_ref[...]  # gamma folded in
    y = d * scale + beta_ref[...]

    # Dropout: identity (eval mode).
    o_ref[...] = y.astype(o_ref.dtype)


@jax.jit
def bert_embeddings(input_ids, word_table, pos_table, gamma, beta):
    B, S = input_ids.shape
    V, H = word_table.shape

    # Seq-tile: sublane-dense (multiple of 8), large enough to amortize the
    # ~0.35 us per-grid-step overhead; capped at 128 rows of gathers in flight.
    T = min(128, _round_up(S, 8))
    S_pad = _round_up(S, T)
    nt = S_pad // T

    ids = input_ids.astype(jnp.int32)
    if S_pad != S:
        # Padded tokens gather row 0 (a valid row) and are sliced off below.
        ids = jnp.pad(ids, ((0, 0), (0, S_pad - S)))

    # Positions are arange(S) (position_ids=None, past_key_values_length=0),
    # so the per-tile position rows are a contiguous slab of the table.
    ptab = pos_table
    if ptab.shape[0] < S_pad:
        ptab = jnp.pad(ptab, ((0, S_pad - ptab.shape[0]), (0, 0)))

    gamma2d = gamma.reshape(1, H)
    beta2d = beta.reshape(1, H)

    grid_spec = pltpu.PrefetchScalarGridSpec(
        num_scalar_prefetch=1,                               # token ids -> SMEM
        grid=(B, nt),
        in_specs=[
            pl.BlockSpec(memory_space=pl.ANY),                   # word table stays in HBM
            pl.BlockSpec((T, H), lambda b, t, ids: (t, 0)),      # position slab
            pl.BlockSpec((1, H), lambda b, t, ids: (0, 0)),      # LN gamma
            pl.BlockSpec((1, H), lambda b, t, ids: (0, 0)),      # LN beta
        ],
        out_specs=pl.BlockSpec((T, H), lambda b, t, ids: (b * nt + t, 0)),
        scratch_shapes=[
            pltpu.VMEM((2 * T, H), jnp.float32),             # double-buffered word rows
            pltpu.SemaphoreType.DMA((2,)),                   # one shared sem per slot
        ],
    )

    out = pl.pallas_call(
        _bert_embeddings_kernel,
        out_shape=jax.ShapeDtypeStruct((B * S_pad, H), jnp.float32),
        grid_spec=grid_spec,
        compiler_params=pltpu.CompilerParams(
            # batch axis shardable across cores; seq-tile axis carries the
            # cross-step prefetch, so it stays "arbitrary".
            dimension_semantics=("parallel", "arbitrary")),
    )(ids, word_table, ptab, gamma2d, beta2d)

    return out.reshape(B, S_pad, H)[:, :S, :]


def bert_embeddings_ref(input_ids, word_table, pos_table, gamma, beta):
    """Pure-JAX reference (mirrors the PyTorch forward, eval mode)."""
    S = input_ids.shape[1]
    emb = jnp.take(word_table, input_ids, axis=0)          # (B, S, H)
    emb = emb + pos_table[:S][None, :, :]                  # absolute pos emb
    mean = jnp.mean(emb, axis=-1, keepdims=True)
    var = jnp.mean((emb - mean) ** 2, axis=-1, keepdims=True)
    y = (emb - mean) * lax.rsqrt(var + LAYER_NORM_EPS)
    return y * gamma + beta                                # dropout = identity


if __name__ == "__main__":
    key = jax.random.PRNGKey(0)
    k_word, k_pos, k_ids = jax.random.split(key, 3)

    # Deterministic parameter init (BERT-style N(0, 0.02); LN gamma=1, beta=0).
    word_table = 0.02 * jax.random.normal(
        k_word, (VOCAB_SIZE, HIDDEN), dtype=jnp.float32)
    # nn.Embedding(padding_idx=0) zeros the pad row.
    word_table = word_table.at[PAD_TOKEN_ID].set(0.0)
    pos_table = 0.02 * jax.random.normal(
        k_pos, (MAX_POS, HIDDEN), dtype=jnp.float32)
    gamma = jnp.ones((HIDDEN,), dtype=jnp.float32)
    beta = jnp.zeros((HIDDEN,), dtype=jnp.float32)

    # Synthetic "tokenized report": ids in [1, VOCAB_SIZE).
    input_ids = jax.random.randint(
        k_ids, (BATCH, SEQ), 1, VOCAB_SIZE, dtype=jnp.int32)

    out = bert_embeddings(input_ids, word_table, pos_table, gamma, beta)
    out = jax.block_until_ready(out)

    ref = bert_embeddings_ref(input_ids, word_table, pos_table, gamma, beta)
    assert out.shape == (BATCH, SEQ, HIDDEN)
    assert jnp.allclose(out, ref, atol=1e-5, rtol=1e-5), "mismatch vs reference"

    print("KERNEL_OK")
</pallas_src>

<mosaic_0001>
module attributes {stable_mosaic.version = 11 : i64} {
  func.func @_bert_embeddings_kernel(%arg0: i32, %arg1: i32, %arg2: memref<2x8xi32, #tpu.memory_space<smem>>, %arg3: memref<512x128xf32, #tpu.memory_space<any>>, %arg4: memref<8x128xf32, #tpu.memory_space<vmem>>, %arg5: memref<1x128xf32, #tpu.memory_space<vmem>>, %arg6: memref<1x128xf32, #tpu.memory_space<vmem>>, %arg7: memref<8x128xf32, #tpu.memory_space<vmem>>, %arg8: memref<16x128xf32, #tpu.memory_space<vmem>>, %arg9: memref<2x!tpu.dma_semaphore, #tpu.memory_space<semaphore_mem>>) attributes {dimension_semantics = [#tpu.dimension_semantics<parallel>, #tpu.dimension_semantics<arbitrary>], iteration_bounds = array<i64: 2, 1>, scalar_prefetch = 1 : i64, scratch_operands = 2 : i64, tpu.core_type = #tpu.core_type<tc>, window_params = [{}, {transform_indices = @transform_1, window_bounds = array<i64: 8, 128>}, {pipeline_mode = #tpu.pipeline_mode<synchronous>, transform_indices = @transform_2, window_bounds = array<i64: 1, 128>}, {pipeline_mode = #tpu.pipeline_mode<synchronous>, transform_indices = @transform_3, window_bounds = array<i64: 1, 128>}, {transform_indices = @transform_4, window_bounds = array<i64: 8, 128>}]} {
    %c2_i32 = arith.constant 2 : i32
    %c0_i32 = arith.constant 0 : i32
    %0 = arith.cmpi eq, %c2_i32, %c0_i32 : i32
    %c1_i32 = arith.constant 1 : i32
    %1 = arith.select %0, %c1_i32, %c2_i32 : i32
    %2 = arith.remsi %arg1, %1 : i32
    %c0_i32_0 = arith.constant 0 : i32
    %3 = arith.cmpi ne, %2, %c0_i32_0 : i32
    %c0_i32_1 = arith.constant 0 : i32
    %4 = arith.cmpi slt, %2, %c0_i32_1 : i32
    %c0_i32_2 = arith.constant 0 : i32
    %5 = arith.cmpi slt, %1, %c0_i32_2 : i32
    %6 = arith.xori %4, %5 : i1
    %7 = arith.andi %6, %3 : i1
    %8 = arith.addi %2, %1 : i32
    %9 = arith.select %7, %8, %2 : i32
    %c0_i32_3 = arith.constant 0 : i32
    %10 = arith.cmpi eq, %arg1, %c0_i32_3 : i32
    %11 = arith.extui %10 : i1 to i32
    %c0_i32_4 = arith.constant 0 : i32
    %12 = arith.cmpi ne, %11, %c0_i32_4 : i32
    scf.if %12 {
      %50 = arith.index_cast %arg0 : i32 to index
      %c0_22 = arith.constant 0 : index
      %51 = memref.load %arg2[%50, %c0_22] : memref<2x8xi32, #tpu.memory_space<smem>>
      %c0_i32_23 = arith.constant 0 : i32
      %c0_i32_24 = arith.constant 0 : i32
      %52 = tpu.memref_slice %arg3[%51, %c0_i32_24] : memref<512x128xf32, #tpu.memory_space<any>> -> memref<1x128xf32, #tpu.memory_space<any>>
      %c0_i32_25 = arith.constant 0 : i32
      %c0_i32_26 = arith.constant 0 : i32
      %53 = tpu.memref_slice %arg8[%c0_i32_25, %c0_i32_26] : memref<16x128xf32, #tpu.memory_space<vmem>> -> memref<1x128xf32, #tpu.memory_space<vmem>>
      %54 = tpu.memref_slice %arg9[%c0_i32_23] : memref<2x!tpu.dma_semaphore, #tpu.memory_space<semaphore_mem>> -> memref<1x!tpu.dma_semaphore, #tpu.memory_space<semaphore_mem>>
      %55 = tpu.memref_squeeze %54 : memref<1x!tpu.dma_semaphore, #tpu.memory_space<semaphore_mem>> -> memref<!tpu.dma_semaphore, #tpu.memory_space<semaphore_mem>>
      tpu.enqueue_dma source(%52 : memref<1x128xf32, #tpu.memory_space<any>>) target(%53 : memref<1x128xf32, #tpu.memory_space<vmem>>) target_semaphore(%55 : memref<!tpu.dma_semaphore, #tpu.memory_space<semaphore_mem>>)
      %56 = arith.index_cast %arg0 : i32 to index
      %c1 = arith.constant 1 : index
      %57 = memref.load %arg2[%56, %c1] : memref<2x8xi32, #tpu.memory_space<smem>>
      %c0_i32_27 = arith.constant 0 : i32
      %c0_i32_28 = arith.constant 0 : i32
      %58 = tpu.memref_slice %arg3[%57, %c0_i32_28] : memref<512x128xf32, #tpu.memory_space<any>> -> memref<1x128xf32, #tpu.memory_space<any>>
      %c1_i32_29 = arith.constant 1 : i32
      %c0_i32_30 = arith.constant 0 : i32
      %59 = tpu.memref_slice %arg8[%c1_i32_29, %c0_i32_30] : memref<16x128xf32, #tpu.memory_space<vmem>> -> memref<1x128xf32, #tpu.memory_space<vmem>>
      %60 = tpu.memref_slice %arg9[%c0_i32_27] : memref<2x!tpu.dma_semaphore, #tpu.memory_space<semaphore_mem>> -> memref<1x!tpu.dma_semaphore, #tpu.memory_space<semaphore_mem>>
      %61 = tpu.memref_squeeze %60 : memref<1x!tpu.dma_semaphore, #tpu.memory_space<semaphore_mem>> -> memref<!tpu.dma_semaphore, #tpu.memory_space<semaphore_mem>>
      tpu.enqueue_dma source(%58 : memref<1x128xf32, #tpu.memory_space<any>>) target(%59 : memref<1x128xf32, #tpu.memory_space<vmem>>) target_semaphore(%61 : memref<!tpu.dma_semaphore, #tpu.memory_space<semaphore_mem>>)
      %62 = arith.index_cast %arg0 : i32 to index
      %c2 = arith.constant 2 : index
      %63 = memref.load %arg2[%62, %c2] : memref<2x8xi32, #tpu.memory_space<smem>>
      %c0_i32_31 = arith.constant 0 : i32
      %c0_i32_32 = arith.constant 0 : i32
      %64 = tpu.memref_slice %arg3[%63, %c0_i32_32] : memref<512x128xf32, #tpu.memory_space<any>> -> memref<1x128xf32, #tpu.memory_space<any>>
      %c2_i32_33 = arith.constant 2 : i32
      %c0_i32_34 = arith.constant 0 : i32
      %65 = tpu.memref_slice %arg8[%c2_i32_33, %c0_i32_34] : memref<16x128xf32, #tpu.memory_space<vmem>> -> memref<1x128xf32, #tpu.memory_space<vmem>>
      %66 = tpu.memref_slice %arg9[%c0_i32_31] : memref<2x!tpu.dma_semaphore, #tpu.memory_space<semaphore_mem>> -> memref<1x!tpu.dma_semaphore, #tpu.memory_space<semaphore_mem>>
      %67 = tpu.memref_squeeze %66 : memref<1x!tpu.dma_semaphore, #tpu.memory_space<semaphore_mem>> -> memref<!tpu.dma_semaphore, #tpu.memory_space<semaphore_mem>>
      tpu.enqueue_dma source(%64 : memref<1x128xf32, #tpu.memory_space<any>>) target(%65 : memref<1x128xf32, #tpu.memory_space<vmem>>) target_semaphore(%67 : memref<!tpu.dma_semaphore, #tpu.memory_space<semaphore_mem>>)
      %68 = arith.index_cast %arg0 : i32 to index
      %c3 = arith.constant 3 : index
      %69 = memref.load %arg2[%68, %c3] : memref<2x8xi32, #tpu.memory_space<smem>>
      %c0_i32_35 = arith.constant 0 : i32
      %c0_i32_36 = arith.constant 0 : i32
      %70 = tpu.memref_slice %arg3[%69, %c0_i32_36] : memref<512x128xf32, #tpu.memory_space<any>> -> memref<1x128xf32, #tpu.memory_space<any>>
      %c3_i32 = arith.constant 3 : i32
      %c0_i32_37 = arith.constant 0 : i32
      %71 = tpu.memref_slice %arg8[%c3_i32, %c0_i32_37] : memref<16x128xf32, #tpu.memory_space<vmem>> -> memref<1x128xf32, #tpu.memory_space<vmem>>
      %72 = tpu.memref_slice %arg9[%c0_i32_35] : memref<2x!tpu.dma_semaphore, #tpu.memory_space<semaphore_mem>> -> memref<1x!tpu.dma_semaphore, #tpu.memory_space<semaphore_mem>>
      %73 = tpu.memref_squeeze %72 : memref<1x!tpu.dma_semaphore, #tpu.memory_space<semaphore_mem>> -> memref<!tpu.dma_semaphore, #tpu.memory_space<semaphore_mem>>
      tpu.enqueue_dma source(%70 : memref<1x128xf32, #tpu.memory_space<any>>) target(%71 : memref<1x128xf32, #tpu.memory_space<vmem>>) target_semaphore(%73 : memref<!tpu.dma_semaphore, #tpu.memory_space<semaphore_mem>>)
      %74 = arith.index_cast %arg0 : i32 to index
      %c4 = arith.constant 4 : index
      %75 = memref.load %arg2[%74, %c4] : memref<2x8xi32, #tpu.memory_space<smem>>
      %c0_i32_38 = arith.constant 0 : i32
      %c0_i32_39 = arith.constant 0 : i32
      %76 = tpu.memref_slice %arg3[%75, %c0_i32_39] : memref<512x128xf32, #tpu.memory_space<any>> -> memref<1x128xf32, #tpu.memory_space<any>>
      %c4_i32 = arith.constant 4 : i32
      %c0_i32_40 = arith.constant 0 : i32
      %77 = tpu.memref_slice %arg8[%c4_i32, %c0_i32_40] : memref<16x128xf32, #tpu.memory_space<vmem>> -> memref<1x128xf32, #tpu.memory_space<vmem>>
      %78 = tpu.memref_slice %arg9[%c0_i32_38] : memref<2x!tpu.dma_semaphore, #tpu.memory_space<semaphore_mem>> -> memref<1x!tpu.dma_semaphore, #tpu.memory_space<semaphore_mem>>
      %79 = tpu.memref_squeeze %78 : memref<1x!tpu.dma_semaphore, #tpu.memory_space<semaphore_mem>> -> memref<!tpu.dma_semaphore, #tpu.memory_space<semaphore_mem>>
      tpu.enqueue_dma source(%76 : memref<1x128xf32, #tpu.memory_space<any>>) target(%77 : memref<1x128xf32, #tpu.memory_space<vmem>>) target_semaphore(%79 : memref<!tpu.dma_semaphore, #tpu.memory_space<semaphore_mem>>)
      %80 = arith.index_cast %arg0 : i32 to index
      %c5 = arith.constant 5 : index
      %81 = memref.load %arg2[%80, %c5] : memref<2x8xi32, #tpu.memory_space<smem>>
      %c0_i32_41 = arith.constant 0 : i32
      %c0_i32_42 = arith.constant 0 : i32
      %82 = tpu.memref_slice %arg3[%81, %c0_i32_42] : memref<512x128xf32, #tpu.memory_space<any>> -> memref<1x128xf32, #tpu.memory_space<any>>
      %c5_i32 = arith.constant 5 : i32
      %c0_i32_43 = arith.constant 0 : i32
      %83 = tpu.memref_slice %arg8[%c5_i32, %c0_i32_43] : memref<16x128xf32, #tpu.memory_space<vmem>> -> memref<1x128xf32, #tpu.memory_space<vmem>>
      %84 = tpu.memref_slice %arg9[%c0_i32_41] : memref<2x!tpu.dma_semaphore, #tpu.memory_space<semaphore_mem>> -> memref<1x!tpu.dma_semaphore, #tpu.memory_space<semaphore_mem>>
      %85 = tpu.memref_squeeze %84 : memref<1x!tpu.dma_semaphore, #tpu.memory_space<semaphore_mem>> -> memref<!tpu.dma_semaphore, #tpu.memory_space<semaphore_mem>>
      tpu.enqueue_dma source(%82 : memref<1x128xf32, #tpu.memory_space<any>>) target(%83 : memref<1x128xf32, #tpu.memory_space<vmem>>) target_semaphore(%85 : memref<!tpu.dma_semaphore, #tpu.memory_space<semaphore_mem>>)
      %86 = arith.index_cast %arg0 : i32 to index
      %c6 = arith.constant 6 : index
      %87 = memref.load %arg2[%86, %c6] : memref<2x8xi32, #tpu.memory_space<smem>>
      %c0_i32_44 = arith.constant 0 : i32
      %c0_i32_45 = arith.constant 0 : i32
      %88 = tpu.memref_slice %arg3[%87, %c0_i32_45] : memref<512x128xf32, #tpu.memory_space<any>> -> memref<1x128xf32, #tpu.memory_space<any>>
      %c6_i32 = arith.constant 6 : i32
      %c0_i32_46 = arith.constant 0 : i32
      %89 = tpu.memref_slice %arg8[%c6_i32, %c0_i32_46] : memref<16x128xf32, #tpu.memory_space<vmem>> -> memref<1x128xf32, #tpu.memory_space<vmem>>
      %90 = tpu.memref_slice %arg9[%c0_i32_44] : memref<2x!tpu.dma_semaphore, #tpu.memory_space<semaphore_mem>> -> memref<1x!tpu.dma_semaphore, #tpu.memory_space<semaphore_mem>>
      %91 = tpu.memref_squeeze %90 : memref<1x!tpu.dma_semaphore, #tpu.memory_space<semaphore_mem>> -> memref<!tpu.dma_semaphore, #tpu.memory_space<semaphore_mem>>
      tpu.enqueue_dma source(%88 : memref<1x128xf32, #tpu.memory_space<any>>) target(%89 : memref<1x128xf32, #tpu.memory_space<vmem>>) target_semaphore(%91 : memref<!tpu.dma_semaphore, #tpu.memory_space<semaphore_mem>>)
      %92 = arith.index_cast %arg0 : i32 to index
      %c7 = arith.constant 7 : index
      %93 = memref.load %arg2[%92, %c7] : memref<2x8xi32, #tpu.memory_space<smem>>
      %c0_i32_47 = arith.constant 0 : i32
      %c0_i32_48 = arith.constant 0 : i32
      %94 = tpu.memref_slice %arg3[%93, %c0_i32_48] : memref<512x128xf32, #tpu.memory_space<any>> -> memref<1x128xf32, #tpu.memory_space<any>>
      %c7_i32 = arith.constant 7 : i32
      %c0_i32_49 = arith.constant 0 : i32
      %95 = tpu.memref_slice %arg8[%c7_i32, %c0_i32_49] : memref<16x128xf32, #tpu.memory_space<vmem>> -> memref<1x128xf32, #tpu.memory_space<vmem>>
      %96 = tpu.memref_slice %arg9[%c0_i32_47] : memref<2x!tpu.dma_semaphore, #tpu.memory_space<semaphore_mem>> -> memref<1x!tpu.dma_semaphore, #tpu.memory_space<semaphore_mem>>
      %97 = tpu.memref_squeeze %96 : memref<1x!tpu.dma_semaphore, #tpu.memory_space<semaphore_mem>> -> memref<!tpu.dma_semaphore, #tpu.memory_space<semaphore_mem>>
      tpu.enqueue_dma source(%94 : memref<1x128xf32, #tpu.memory_space<any>>) target(%95 : memref<1x128xf32, #tpu.memory_space<vmem>>) target_semaphore(%97 : memref<!tpu.dma_semaphore, #tpu.memory_space<semaphore_mem>>)
    } else {
    }
    %c1_i32_5 = arith.constant 1 : i32
    %13 = arith.addi %arg1, %c1_i32_5 : i32
    %c1_i32_6 = arith.constant 1 : i32
    %14 = arith.cmpi slt, %13, %c1_i32_6 : i32
    %15 = arith.extui %14 : i1 to i32
    %c0_i32_7 = arith.constant 0 : i32
    %16 = arith.cmpi ne, %15, %c0_i32_7 : i32
    scf.if %16 {
      %c1_i32_22 = arith.constant 1 : i32
      %50 = arith.addi %arg1, %c1_i32_22 : i32
      %c1_i32_23 = arith.constant 1 : i32
      %51 = arith.subi %c1_i32_23, %9 : i32
      %c8_i32_24 = arith.constant 8 : i32
      %52 = arith.muli %50, %c8_i32_24 : i32
      %c8_i32_25 = arith.constant 8 : i32
      %53 = arith.muli %51, %c8_i32_25 : i32
      %c0_i32_26 = arith.constant 0 : i32
      %54 = arith.addi %52, %c0_i32_26 : i32
      %55 = arith.index_cast %arg0 : i32 to index
      %56 = arith.index_cast %54 : i32 to index
      %57 = memref.load %arg2[%55, %56] : memref<2x8xi32, #tpu.memory_space<smem>>
      %c0_i32_27 = arith.constant 0 : i32
      %58 = arith.addi %53, %c0_i32_27 : i32
      %c0_i32_28 = arith.constant 0 : i32
      %59 = tpu.memref_slice %arg3[%57, %c0_i32_28] : memref<512x128xf32, #tpu.memory_space<any>> -> memref<1x128xf32, #tpu.memory_space<any>>
      %c0_i32_29 = arith.constant 0 : i32
      %60 = tpu.memref_slice %arg8[%58, %c0_i32_29] : memref<16x128xf32, #tpu.memory_space<vmem>> -> memref<1x128xf32, #tpu.memory_space<vmem>>
      %61 = tpu.memref_slice %arg9[%51] : memref<2x!tpu.dma_semaphore, #tpu.memory_space<semaphore_mem>> -> memref<1x!tpu.dma_semaphore, #tpu.memory_space<semaphore_mem>>
      %62 = tpu.memref_squeeze %61 : memref<1x!tpu.dma_semaphore, #tpu.memory_space<semaphore_mem>> -> memref<!tpu.dma_semaphore, #tpu.memory_space<semaphore_mem>>
      tpu.enqueue_dma source(%59 : memref<1x128xf32, #tpu.memory_space<any>>) target(%60 : memref<1x128xf32, #tpu.memory_space<vmem>>) target_semaphore(%62 : memref<!tpu.dma_semaphore, #tpu.memory_space<semaphore_mem>>)
      %c1_i32_30 = arith.constant 1 : i32
      %63 = arith.addi %52, %c1_i32_30 : i32
      %64 = arith.index_cast %arg0 : i32 to index
      %65 = arith.index_cast %63 : i32 to index
      %66 = memref.load %arg2[%64, %65] : memref<2x8xi32, #tpu.memory_space<smem>>
      %c1_i32_31 = arith.constant 1 : i32
      %67 = arith.addi %53, %c1_i32_31 : i32
      %c0_i32_32 = arith.constant 0 : i32
      %68 = tpu.memref_slice %arg3[%66, %c0_i32_32] : memref<512x128xf32, #tpu.memory_space<any>> -> memref<1x128xf32, #tpu.memory_space<any>>
      %c0_i32_33 = arith.constant 0 : i32
      %69 = tpu.memref_slice %arg8[%67, %c0_i32_33] : memref<16x128xf32, #tpu.memory_space<vmem>> -> memref<1x128xf32, #tpu.memory_space<vmem>>
      %70 = tpu.memref_slice %arg9[%51] : memref<2x!tpu.dma_semaphore, #tpu.memory_space<semaphore_mem>> -> memref<1x!tpu.dma_semaphore, #tpu.memory_space<semaphore_mem>>
      %71 = tpu.memref_squeeze %70 : memref<1x!tpu.dma_semaphore, #tpu.memory_space<semaphore_mem>> -> memref<!tpu.dma_semaphore, #tpu.memory_space<semaphore_mem>>
      tpu.enqueue_dma source(%68 : memref<1x128xf32, #tpu.memory_space<any>>) target(%69 : memref<1x128xf32, #tpu.memory_space<vmem>>) target_semaphore(%71 : memref<!tpu.dma_semaphore, #tpu.memory_space<semaphore_mem>>)
      %c2_i32_34 = arith.constant 2 : i32
      %72 = arith.addi %52, %c2_i32_34 : i32
      %73 = arith.index_cast %arg0 : i32 to index
      %74 = arith.index_cast %72 : i32 to index
      %75 = memref.load %arg2[%73, %74] : memref<2x8xi32, #tpu.memory_space<smem>>
      %c2_i32_35 = arith.constant 2 : i32
      %76 = arith.addi %53, %c2_i32_35 : i32
      %c0_i32_36 = arith.constant 0 : i32
      %77 = tpu.memref_slice %arg3[%75, %c0_i32_36] : memref<512x128xf32, #tpu.memory_space<any>> -> memref<1x128xf32, #tpu.memory_space<any>>
      %c0_i32_37 = arith.constant 0 : i32
      %78 = tpu.memref_slice %arg8[%76, %c0_i32_37] : memref<16x128xf32, #tpu.memory_space<vmem>> -> memref<1x128xf32, #tpu.memory_space<vmem>>
      %79 = tpu.memref_slice %arg9[%51] : memref<2x!tpu.dma_semaphore, #tpu.memory_space<semaphore_mem>> -> memref<1x!tpu.dma_semaphore, #tpu.memory_space<semaphore_mem>>
      %80 = tpu.memref_squeeze %79 : memref<1x!tpu.dma_semaphore, #tpu.memory_space<semaphore_mem>> -> memref<!tpu.dma_semaphore, #tpu.memory_space<semaphore_mem>>
      tpu.enqueue_dma source(%77 : memref<1x128xf32, #tpu.memory_space<any>>) target(%78 : memref<1x128xf32, #tpu.memory_space<vmem>>) target_semaphore(%80 : memref<!tpu.dma_semaphore, #tpu.memory_space<semaphore_mem>>)
      %c3_i32 = arith.constant 3 : i32
      %81 = arith.addi %52, %c3_i32 : i32
      %82 = arith.index_cast %arg0 : i32 to index
      %83 = arith.index_cast %81 : i32 to index
      %84 = memref.load %arg2[%82, %83] : memref<2x8xi32, #tpu.memory_space<smem>>
      %c3_i32_38 = arith.constant 3 : i32
      %85 = arith.addi %53, %c3_i32_38 : i32
      %c0_i32_39 = arith.constant 0 : i32
      %86 = tpu.memref_slice %arg3[%84, %c0_i32_39] : memref<512x128xf32, #tpu.memory_space<any>> -> memref<1x128xf32, #tpu.memory_space<any>>
      %c0_i32_40 = arith.constant 0 : i32
      %87 = tpu.memref_slice %arg8[%85, %c0_i32_40] : memref<16x128xf32, #tpu.memory_space<vmem>> -> memref<1x128xf32, #tpu.memory_space<vmem>>
      %88 = tpu.memref_slice %arg9[%51] : memref<2x!tpu.dma_semaphore, #tpu.memory_space<semaphore_mem>> -> memref<1x!tpu.dma_semaphore, #tpu.memory_space<semaphore_mem>>
      %89 = tpu.memref_squeeze %88 : memref<1x!tpu.dma_semaphore, #tpu.memory_space<semaphore_mem>> -> memref<!tpu.dma_semaphore, #tpu.memory_space<semaphore_mem>>
      tpu.enqueue_dma source(%86 : memref<1x128xf32, #tpu.memory_space<any>>) target(%87 : memref<1x128xf32, #tpu.memory_space<vmem>>) target_semaphore(%89 : memref<!tpu.dma_semaphore, #tpu.memory_space<semaphore_mem>>)
      %c4_i32 = arith.constant 4 : i32
      %90 = arith.addi %52, %c4_i32 : i32
      %91 = arith.index_cast %arg0 : i32 to index
      %92 = arith.index_cast %90 : i32 to index
      %93 = memref.load %arg2[%91, %92] : memref<2x8xi32, #tpu.memory_space<smem>>
      %c4_i32_41 = arith.constant 4 : i32
      %94 = arith.addi %53, %c4_i32_41 : i32
      %c0_i32_42 = arith.constant 0 : i32
      %95 = tpu.memref_slice %arg3[%93, %c0_i32_42] : memref<512x128xf32, #tpu.memory_space<any>> -> memref<1x128xf32, #tpu.memory_space<any>>
      %c0_i32_43 = arith.constant 0 : i32
      %96 = tpu.memref_slice %arg8[%94, %c0_i32_43] : memref<16x128xf32, #tpu.memory_space<vmem>> -> memref<1x128xf32, #tpu.memory_space<vmem>>
      %97 = tpu.memref_slice %arg9[%51] : memref<2x!tpu.dma_semaphore, #tpu.memory_space<semaphore_mem>> -> memref<1x!tpu.dma_semaphore, #tpu.memory_space<semaphore_mem>>
      %98 = tpu.memref_squeeze %97 : memref<1x!tpu.dma_semaphore, #tpu.memory_space<semaphore_mem>> -> memref<!tpu.dma_semaphore, #tpu.memory_space<semaphore_mem>>
      tpu.enqueue_dma source(%95 : memref<1x128xf32, #tpu.memory_space<any>>) target(%96 : memref<1x128xf32, #tpu.memory_space<vmem>>) target_semaphore(%98 : memref<!tpu.dma_semaphore, #tpu.memory_space<semaphore_mem>>)
      %c5_i32 = arith.constant 5 : i32
      %99 = arith.addi %52, %c5_i32 : i32
      %100 = arith.index_cast %arg0 : i32 to index
      %101 = arith.index_cast %99 : i32 to index
      %102 = memref.load %arg2[%100, %101] : memref<2x8xi32, #tpu.memory_space<smem>>
      %c5_i32_44 = arith.constant 5 : i32
      %103 = arith.addi %53, %c5_i32_44 : i32
      %c0_i32_45 = arith.constant 0 : i32
      %104 = tpu.memref_slice %arg3[%102, %c0_i32_45] : memref<512x128xf32, #tpu.memory_space<any>> -> memref<1x128xf32, #tpu.memory_space<any>>
      %c0_i32_46 = arith.constant 0 : i32
      %105 = tpu.memref_slice %arg8[%103, %c0_i32_46] : memref<16x128xf32, #tpu.memory_space<vmem>> -> memref<1x128xf32, #tpu.memory_space<vmem>>
      %106 = tpu.memref_slice %arg9[%51] : memref<2x!tpu.dma_semaphore, #tpu.memory_space<semaphore_mem>> -> memref<1x!tpu.dma_semaphore, #tpu.memory_space<semaphore_mem>>
      %107 = tpu.memref_squeeze %106 : memref<1x!tpu.dma_semaphore, #tpu.memory_space<semaphore_mem>> -> memref<!tpu.dma_semaphore, #tpu.memory_space<semaphore_mem>>
      tpu.enqueue_dma source(%104 : memref<1x128xf32, #tpu.memory_space<any>>) target(%105 : memref<1x128xf32, #tpu.memory_space<vmem>>) target_semaphore(%107 : memref<!tpu.dma_semaphore, #tpu.memory_space<semaphore_mem>>)
      %c6_i32 = arith.constant 6 : i32
      %108 = arith.addi %52, %c6_i32 : i32
      %109 = arith.index_cast %arg0 : i32 to index
      %110 = arith.index_cast %108 : i32 to index
      %111 = memref.load %arg2[%109, %110] : memref<2x8xi32, #tpu.memory_space<smem>>
      %c6_i32_47 = arith.constant 6 : i32
      %112 = arith.addi %53, %c6_i32_47 : i32
      %c0_i32_48 = arith.constant 0 : i32
      %113 = tpu.memref_slice %arg3[%111, %c0_i32_48] : memref<512x128xf32, #tpu.memory_space<any>> -> memref<1x128xf32, #tpu.memory_space<any>>
      %c0_i32_49 = arith.constant 0 : i32
      %114 = tpu.memref_slice %arg8[%112, %c0_i32_49] : memref<16x128xf32, #tpu.memory_space<vmem>> -> memref<1x128xf32, #tpu.memory_space<vmem>>
      %115 = tpu.memref_slice %arg9[%51] : memref<2x!tpu.dma_semaphore, #tpu.memory_space<semaphore_mem>> -> memref<1x!tpu.dma_semaphore, #tpu.memory_space<semaphore_mem>>
      %116 = tpu.memref_squeeze %115 : memref<1x!tpu.dma_semaphore, #tpu.memory_space<semaphore_mem>> -> memref<!tpu.dma_semaphore, #tpu.memory_space<semaphore_mem>>
      tpu.enqueue_dma source(%113 : memref<1x128xf32, #tpu.memory_space<any>>) target(%114 : memref<1x128xf32, #tpu.memory_space<vmem>>) target_semaphore(%116 : memref<!tpu.dma_semaphore, #tpu.memory_space<semaphore_mem>>)
      %c7_i32 = arith.constant 7 : i32
      %117 = arith.addi %52, %c7_i32 : i32
      %118 = arith.index_cast %arg0 : i32 to index
      %119 = arith.index_cast %117 : i32 to index
      %120 = memref.load %arg2[%118, %119] : memref<2x8xi32, #tpu.memory_space<smem>>
      %c7_i32_50 = arith.constant 7 : i32
      %121 = arith.addi %53, %c7_i32_50 : i32
      %c0_i32_51 = arith.constant 0 : i32
      %122 = tpu.memref_slice %arg3[%120, %c0_i32_51] : memref<512x128xf32, #tpu.memory_space<any>> -> memref<1x128xf32, #tpu.memory_space<any>>
      %c0_i32_52 = arith.constant 0 : i32
      %123 = tpu.memref_slice %arg8[%121, %c0_i32_52] : memref<16x128xf32, #tpu.memory_space<vmem>> -> memref<1x128xf32, #tpu.memory_space<vmem>>
      %124 = tpu.memref_slice %arg9[%51] : memref<2x!tpu.dma_semaphore, #tpu.memory_space<semaphore_mem>> -> memref<1x!tpu.dma_semaphore, #tpu.memory_space<semaphore_mem>>
      %125 = tpu.memref_squeeze %124 : memref<1x!tpu.dma_semaphore, #tpu.memory_space<semaphore_mem>> -> memref<!tpu.dma_semaphore, #tpu.memory_space<semaphore_mem>>
      tpu.enqueue_dma source(%122 : memref<1x128xf32, #tpu.memory_space<any>>) target(%123 : memref<1x128xf32, #tpu.memory_space<vmem>>) target_semaphore(%125 : memref<!tpu.dma_semaphore, #tpu.memory_space<semaphore_mem>>)
    } else {
    }
    %c8_i32 = arith.constant 8 : i32
    %17 = arith.muli %9, %c8_i32 : i32
    %18 = tpu.assume_multiple %17, 8 : i32
    %c0_i32_8 = arith.constant 0 : i32
    %19 = tpu.memref_slice %arg8[%18, %c0_i32_8] : memref<16x128xf32, #tpu.memory_space<vmem>> -> memref<8x128xf32, #tpu.memory_space<vmem>>
    %c0_i32_9 = arith.constant 0 : i32
    %20 = tpu.memref_slice %arg8[%18, %c0_i32_9] : memref<16x128xf32, #tpu.memory_space<vmem>> -> memref<8x128xf32, #tpu.memory_space<vmem>>
    %21 = tpu.memref_slice %arg9[%9] : memref<2x!tpu.dma_semaphore, #tpu.memory_space<semaphore_mem>> -> memref<1x!tpu.dma_semaphore, #tpu.memory_space<semaphore_mem>>
    %22 = tpu.memref_squeeze %21 : memref<1x!tpu.dma_semaphore, #tpu.memory_space<semaphore_mem>> -> memref<!tpu.dma_semaphore, #tpu.memory_space<semaphore_mem>>
    tpu.wait_dma2 semaphore(%22 : memref<!tpu.dma_semaphore, #tpu.memory_space<semaphore_mem>>) src(%19 : memref<8x128xf32, #tpu.memory_space<vmem>>) dst(%20 : memref<8x128xf32, #tpu.memory_space<vmem>>)
    %23 = arith.index_cast %18 : i32 to index
    %c0 = arith.constant 0 : index
    %24 = vector.load %arg8[%23, %c0] : memref<16x128xf32, #tpu.memory_space<vmem>>, vector<8x128xf32>
    %c0_10 = arith.constant 0 : index
    %c0_11 = arith.constant 0 : index
    %25 = vector.load %arg4[%c0_10, %c0_11] : memref<8x128xf32, #tpu.memory_space<vmem>>, vector<8x128xf32>
    %26 = arith.addf %24, %25 : vector<8x128xf32>
    %cst = arith.constant dense<0.000000e+00> : vector<8xf32>
    %27 = vector.multi_reduction <add>, %26, %cst [1] : vector<8x128xf32> to vector<8xf32>
    %28 = vector.shape_cast %27 : vector<8xf32> to vector<8x1xf32>
    %cst_12 = arith.constant 7.812500e-03 : f32
    %29 = vector.broadcast %cst_12 : f32 to vector<8x1xf32>
    %30 = arith.mulf %28, %29 : vector<8x1xf32>
    %31 = vector.broadcast %30 : vector<8x1xf32> to vector<8x128xf32>
    %32 = arith.subf %26, %31 : vector<8x128xf32>
    %33 = arith.mulf %32, %32 : vector<8x128xf32>
    %cst_13 = arith.constant dense<0.000000e+00> : vector<8xf32>
    %34 = vector.multi_reduction <add>, %33, %cst_13 [1] : vector<8x128xf32> to vector<8xf32>
    %35 = vector.shape_cast %34 : vector<8xf32> to vector<8x1xf32>
    %cst_14 = arith.constant 7.812500e-03 : f32
    %36 = vector.broadcast %cst_14 : f32 to vector<8x1xf32>
    %37 = arith.mulf %35, %36 : vector<8x1xf32>
    %cst_15 = arith.constant 9.99999996E-13 : f32
    %38 = vector.broadcast %cst_15 : f32 to vector<8x1xf32>
    %39 = arith.addf %37, %38 : vector<8x1xf32>
    %40 = math.rsqrt %39 : vector<8x1xf32>
    %c0_16 = arith.constant 0 : index
    %c0_17 = arith.constant 0 : index
    %41 = vector.load %arg5[%c0_16, %c0_17] : memref<1x128xf32, #tpu.memory_space<vmem>>, vector<1x128xf32>
    %42 = vector.broadcast %40 : vector<8x1xf32> to vector<8x128xf32>
    %43 = vector.broadcast %41 : vector<1x128xf32> to vector<8x128xf32>
    %44 = arith.mulf %42, %43 : vector<8x128xf32>
    %45 = arith.mulf %32, %44 : vector<8x128xf32>
    %c0_18 = arith.constant 0 : index
    %c0_19 = arith.constant 0 : index
    %46 = vector.load %arg6[%c0_18, %c0_19] : memref<1x128xf32, #tpu.memory_space<vmem>>, vector<1x128xf32>
    %47 = vector.broadcast %46 : vector<1x128xf32> to vector<8x128xf32>
    %48 = arith.addf %45, %47 : vector<8x128xf32>
    %c0_20 = arith.constant 0 : index
    %c0_21 = arith.constant 0 : index
    %49 = vector.load %arg7[%c0_20, %c0_21] : memref<8x128xf32, #tpu.memory_space<vmem>>, vector<8x128xf32>
    tpu.vector_store %arg7[%c0_20, %c0_21], %48 {strides = array<i32>} : memref<8x128xf32, #tpu.memory_space<vmem>>, vector<8x128xf32>,
    return
  }
  func.func @transform_1(%arg0: i32, %arg1: i32, %arg2: memref<2x8xi32, #tpu.memory_space<smem>>) -> (i32, i32) {
    %c0_i32 = arith.constant 0 : i32
    %c0_i32_0 = arith.constant 0 : i32
    return %arg1, %c0_i32 : i32, i32
  }
  func.func @transform_2(%arg0: i32, %arg1: i32, %arg2: memref<2x8xi32, #tpu.memory_space<smem>>) -> (i32, i32) {
    %c0_i32 = arith.constant 0 : i32
    %c0_i32_0 = arith.constant 0 : i32
    %c0_i32_1 = arith.constant 0 : i32
    return %c0_i32, %c0_i32_0 : i32, i32
  }
  func.func @transform_3(%arg0: i32, %arg1: i32, %arg2: memref<2x8xi32, #tpu.memory_space<smem>>) -> (i32, i32) {
    %c0_i32 = arith.constant 0 : i32
    %c0_i32_0 = arith.constant 0 : i32
    %c0_i32_1 = arith.constant 0 : i32
    return %c0_i32, %c0_i32_0 : i32, i32
  }
  func.func @transform_4(%arg0: i32, %arg1: i32, %arg2: memref<2x8xi32, #tpu.memory_space<smem>>) -> (i32, i32) {
    %c1_i32 = arith.constant 1 : i32
    %0 = arith.muli %arg0, %c1_i32 : i32
    %1 = arith.addi %0, %arg1 : i32
    %c0_i32 = arith.constant 0 : i32
    %c0_i32_0 = arith.constant 0 : i32
    return %1, %c0_i32 : i32, i32
  }
}

</mosaic_0001>

<bundles_post_ra>
// kernel: bert_embeddings.1
= control target key start
LH: loop header
LB: loop body
LE: loop exit
PB: predicated region body
PF: predicated region fallthrough
CT: control target
= control target key end

     0   :  { %s1167_s21 = smov [#allocation5]   ;;  %s1415_s0 = inlined_call_operand.hbm [shape: s32[2,8], index: 0, kind: input, shape index: {}]   ;;  %s1416_s1 = inlined_call_operand.hbm [shape: f32[512,128], index: 1, kind: input, shape index: {}]   ;;  %s1417_s2 = inlined_call_operand.hbm [shape: f32[64,128], index: 2, kind: input, shape index: {}]   ;;  %s1418_s3 = inlined_call_operand.vmem [shape: f32[1,128], index: 3, kind: input, shape index: {}]   ;;  %s1419_s4 = inlined_call_operand.vmem [shape: f32[1,128], index: 4, kind: input, shape index: {}]   ;;  %s1420_s5 = inlined_call_operand.hbm [shape: f32[16,128], index: 5, kind: output, shape index: {}]  }
   0x1   :  { %1425 = sst [smem:[#allocation52_spill]] %s1417_s2  ;;  %s11_s20 = sshll.u32 %s1415_s0, 4  ;;  %s12_s20 = int_to_ptr.hbm [resolvable:$true] %s11_s20 }
   0x2   :  { %14 = dma.hbm_to_smem %s12_s20, 32, %s1167_s21, [#allocation4] }
   0x3   :  { %1131 = dma.done.wait [#allocation4], 32 }
   0x4   :  { %1132 = vsyncadd [#allocation4], 4294967264 }
   0x5   :  { %17 = sfence }
   0x6   :  { %18 = vsyncpa [#allocation7], 0 }
   0x7   :  { %19 = vsyncpa [#allocation8], 0 }
   0x8   :  { %21 = vsyncpa [#allocation8 + $0x1], 0  ;;  %s1210_s22 = smov 0   ;;  %s1212_s23 = smov 0  }
   0x9   :  { %s1214_s24 = smov 0   ;;  %s1216_s25 = smov 0  }
   0xa   :  { %s1218_s26 = smov 0   ;;  %s1220_s0 = smov 0  }
   0xb LB: > { %1426 = sst [smem:[#allocation48_spill]] %s1161_s26  ;;  %s737_s27 = sadd.s32 4294967295, %s1165_s0   ;;  %s1165_s0 = sphi %s1220_s0, %s27_s0   ;;  %s1161_s26 = sphi %s1218_s26, %s1438_s26   ;;  %s1157_s25 = sphi %s1216_s25, %s1437_s25   ;;  %s1153_s24 = sphi %s1214_s24, %s1441_s24   ;;  %s1149_s23 = sphi %s1212_s23, %s1440_s23   ;;  %s1145_s22 = sphi %s1210_s22, %s1439_s22  }
   0xc   : > { %s738_s28 = sadd.s32 4294967294, %s1165_s0   ;;  %s39_s29 = sadd.s32 1, %s1161_s26 }
   0xd   : > { %s116_s30 = sadd.s32 1, %s1153_s24  ;;  %p41_p0 = scmp.ge.s32.totalorder %s39_s29, 2 }
   0xe   : > { %p126_p1 = scmp.ne.s32.totalorder %s1153_s24, %s1149_s23  ;;  %p127_p2 = scmp.eq.s32.totalorder %s737_s27, 1 }
   0xf   : > { %p132_p3 = scmp.ne.s32.totalorder %s1149_s23, %s1145_s22  ;;  %s1443_s29 = smov (%p41_p0, %s39_s29), 0 }
  0x10   : > { %1427 = sst [smem:[#allocation49_spill]] %s1443_s29  ;;  %p1250_p4 = por %p127_p2, %p126_p1 }
  0x11   : > { %p133_p5 = scmp.eq.s32.totalorder %s738_s28, 1  ;;  %s113_s7 = ssub.s32 %s1161_s26, %s1443_s29 }
  0x12   : > { %p739_p6 = scmp.ge.s32.totalorder %s1165_s0, 1  ;;  %p114_p7 = scmp.eq.s32.totalorder %s113_s7, 0 }
  0x13   : > { %p1257_p8 = por %p133_p5, %p132_p3  ;;  %p140_p9 = scmp.lt.s32.totalorder %s1165_s0, 3 }
  0x14   : > { %s1263_s9 = scalar_select %p114_p7, %s1153_s24, %s116_s30  }
  0x15   : > { %p141_p10 = pnand %p739_p6, %p140_p9  ;;  %p780_p11 = scmp.eq.s32.totalorder %s737_s27, 0 }
  0x16   : > { %1430 = sst [smem:[#allocation50_spill]] %s1263_s9  ;;  %s1168_s13 = smov [#allocation6]  }
  0x17   : > { %s1431_s2 = sld [smem:[#allocation52_spill]]  ;;  %p772_p12 = pneg %p141_p10 }
  0x18   : > { %s156_s14 = sshll.u32 %s1168_s13, 4  ;;  %s157_s14 = int_to_ptr.vmem [resolvable:$true] %s156_s14 }
  0x19   : > { %p773_p13 = pnand %p780_p11, %p772_p12 }
  0x1a   : > { %175 = sbr.rel (%p141_p10) target bundleno = 416 (0x1a0), region = 32 }
  0x1d   : > { %s154_s12 = sshll.u32 %s1431_s2, 4  ;;  %s155_s12 = int_to_ptr.hbm [resolvable:$true] %s154_s12 }
  0x1e   : > { %775 = dma.hbm_to_vmem [thread:$0]  (!%p773_p13), %s155_s12, 128, %s157_s14, [#allocation7]  }
  0x1f   : > { %1134 = dma.done.wait (%p780_p11), [#allocation7], 128  }
  0x20   : > { %1136 = vsyncadd (%p780_p11), [#allocation7], 4294967168  ;;  %s1421_s15 = sand.u32 1, %s1149_s23   ;;  %s1270_s16 = sshll.u32 %s1157_s25, 7 }
  0x21   : > { %s1274_s17 = sshll.u32 %s1421_s15, 3  ;;  %s213_s18 = sld [smem:[#allocation5 + %s1270_s16]] }
  0x22   : > { %s1169_s19 = smov [#allocation2]   ;;  %s228_s21 = sadd.s32 1, %s1270_s16 }
  0x23   : > { %s224_s20 = sshll.u32 %s1169_s19, 4  ;;  %s229_s27 = sld [smem:[#allocation5 + %s228_s21]]  ;;  %s225_s20 = int_to_ptr.vmem [resolvable:$true] %s224_s20 }
  0x24   : > { %s245_s28 = sadd.s32 2, %s1270_s16  ;;  %s1170_s30 = smov [#allocation2 + $0x1]  }
  0x25   : > { %s1279_s7 = sshll.u32 %s1170_s30, 4  ;;  %s246_s10 = sld [smem:[#allocation5 + %s245_s28]]  ;;  %s242_s7 = int_to_ptr.vmem [resolvable:$true] %s1279_s7 }
  0x26   : > { %s1171_s15 = smov [#allocation2 + $0x2]   ;;  %s1290_s30 = scalar_lea.hbm %s1416_s1, 512 }
  0x27   : > { %s214_s13 = scalar_lea.hbm %s1416_s1, %s213_s18  ;;  %s1285_s2 = sshll.u32 %s1171_s15, 4  ;;  %s259_s2 = int_to_ptr.vmem [resolvable:$true] %s1285_s2 }
  0x28   : > { %s222_s14 = sshll.u32 %s214_s13, 4  ;;  %s223_s14 = int_to_ptr.hbm [resolvable:$true] %s222_s14 }
  0x29   : > { %s887_s19 = sshra.s32 %s223_s14, 4  ;;  %s888_s19 = int_to_ptr.hbm [resolvable:$true] %s887_s19 }
  0x2a   : > { %s889_s29 = scalar_lea.hbm %s888_s19, 1  ;;  %p892_p1 = scmp.lt.s32.totalorder %s888_s19, %s1416_s1 }
  0x2b   : > { %p890_p0 = scmp.ne.s32.totalorder %s888_s19, %s889_s29  ;;  %p893_p2 = scmp.lt.s32.totalorder %s1290_s30, %s889_s29 }
  0x2d   : > { %p894_p3 = por %p893_p2, %p892_p1 }
  0x2f   : > { %p895_p5 = pnand %p894_p3, %p890_p0 }
  0x31   : > { %898 = shalt.err (!%p895_p5)  }
  0x32   : > { %227 = dma.hbm_to_vmem [thread:$0]  %s223_s14, 16, %s225_s20, [#allocation3] }
  0x33   : > { %s230_s11 = scalar_lea.hbm %s1416_s1, %s229_s27  ;;  %s247_s21 = scalar_lea.hbm %s1416_s1, %s246_s10 }
  0x34   : > { %s239_s26 = sshll.u32 %s230_s11, 4  ;;  %s256_s9 = sshll.u32 %s247_s21, 4  ;;  %s240_s26 = int_to_ptr.hbm [resolvable:$true] %s239_s26  ;;  %s257_s9 = int_to_ptr.hbm [resolvable:$true] %s256_s9 }
  0x35   : > { %s911_s19 = sshra.s32 %s240_s26, 4  ;;  %s912_s19 = int_to_ptr.hbm [resolvable:$true] %s911_s19 }
  0x36   : > { %s913_s29 = scalar_lea.hbm %s912_s19, 1  ;;  %p916_p7 = scmp.lt.s32.totalorder %s912_s19, %s1416_s1 }
  0x37   : > { %p914_p6 = scmp.ne.s32.totalorder %s912_s19, %s913_s29  ;;  %p917_p9 = scmp.lt.s32.totalorder %s1290_s30, %s913_s29 }
  0x39   : > { %p918_p10 = por %p917_p9, %p916_p7 }
  0x3b   : > { %p919_p11 = pnand %p918_p10, %p914_p6 }
  0x3d   : > { %922 = shalt.err (!%p919_p11)  }
  0x3e   : > { %244 = dma.hbm_to_vmem [thread:$0]  %s240_s26, 16, %s242_s7, [#allocation3] }
  0x3f   : > { %s262_s27 = sadd.s32 3, %s1270_s16  ;;  %s935_s10 = sshra.s32 %s257_s9, 4  ;;  %s936_s10 = int_to_ptr.hbm [resolvable:$true] %s935_s10 }
  0x40   : > { %s937_s14 = scalar_lea.hbm %s936_s10, 1  ;;  %p940_p13 = scmp.lt.s32.totalorder %s936_s10, %s1416_s1 }
  0x41   : > { %p938_p12 = scmp.ne.s32.totalorder %s936_s10, %s937_s14  ;;  %p941_p0 = scmp.lt.s32.totalorder %s1290_s30, %s937_s14 }
  0x43   : > { %p942_p1 = por %p941_p0, %p940_p13 }
  0x45   : > { %p943_p2 = pnand %p942_p1, %p938_p12 }
  0x47   : > { %946 = shalt.err (!%p943_p2)  }
  0x48   : > { %261 = dma.hbm_to_vmem [thread:$0]  %s257_s9, 16, %s259_s2, [#allocation3] }
  0x49   : > { %s263_s11 = sld [smem:[#allocation5 + %s262_s27]]  ;;  %s1172_s12 = smov [#allocation2 + $0x3]  }
  0x4a   : > { %s275_s7 = sshll.u32 %s1172_s12, 4  ;;  %s279_s26 = sadd.s32 4, %s1270_s16  ;;  %s276_s7 = int_to_ptr.vmem [resolvable:$true] %s275_s7 }
  0x4b   : > { %s280_s13 = sld [smem:[#allocation5 + %s279_s26]]  ;;  %s296_s21 = sadd.s32 5, %s1270_s16 }
  0x4c   : > { %s1173_s19 = smov [#allocation2 + $0x4]   ;;  %s297_s28 = sld [smem:[#allocation5 + %s296_s21]] }
  0x4d   : > { %s1316_s29 = sshll.u32 %s1173_s19, 4  ;;  %s1174_s9 = smov [#allocation2 + $0x5]  }
  0x4e   : > { %1432 = sst [smem:[#allocation51_spill]] %s1316_s29  ;;  %s1322_s14 = sshll.u32 %s1174_s9, 4  ;;  %s310_s14 = int_to_ptr.vmem [resolvable:$true] %s1322_s14 }
  0x4f   : > { %s264_s2 = scalar_lea.hbm %s1416_s1, %s263_s11 }
  0x50   : > { %s273_s27 = sshll.u32 %s264_s2, 4  ;;  %s274_s27 = int_to_ptr.hbm [resolvable:$true] %s273_s27 }
  0x51   : > { %s281_s12 = scalar_lea.hbm %s1416_s1, %s280_s13  ;;  %s959_s26 = sshra.s32 %s274_s27, 4  ;;  %s960_s26 = int_to_ptr.hbm [resolvable:$true] %s959_s26 }
  0x52   : > { %s961_s19 = scalar_lea.hbm %s960_s26, 1  ;;  %p964_p5 = scmp.lt.s32.totalorder %s960_s26, %s1416_s1 }
  0x53   : > { %p962_p3 = scmp.ne.s32.totalorder %s960_s26, %s961_s19  ;;  %p965_p6 = scmp.lt.s32.totalorder %s1290_s30, %s961_s19 }
  0x55   : > { %p966_p7 = por %p965_p6, %p964_p5 }
  0x57   : > { %p967_p9 = pnand %p966_p7, %p962_p3 }
  0x59   : > { %970 = shalt.err (!%p967_p9)  }
  0x5a   : > { %278 = dma.hbm_to_vmem [thread:$0]  %s274_s27, 16, %s276_s7, [#allocation3] }
  0x5b   : > { %s290_s11 = sshll.u32 %s281_s12, 4  ;;  %s298_s2 = scalar_lea.hbm %s1416_s1, %s297_s28  ;;  %s291_s11 = int_to_ptr.hbm [resolvable:$true] %s290_s11 }
  0x5c   : > { %s307_s13 = sshll.u32 %s298_s2, 4  ;;  %s983_s9 = sshra.s32 %s291_s11, 4  ;;  %s984_s9 = int_to_ptr.hbm [resolvable:$true] %s983_s9  ;;  %s308_s13 = int_to_ptr.hbm [resolvable:$true] %s307_s13 }
  0x5d   : > { %s985_s15 = scalar_lea.hbm %s984_s9, 1  ;;  %p988_p11 = scmp.lt.s32.totalorder %s984_s9, %s1416_s1 }
  0x5e   : > { %p986_p10 = scmp.ne.s32.totalorder %s984_s9, %s985_s15  ;;  %p989_p12 = scmp.lt.s32.totalorder %s1290_s30, %s985_s15 }
  0x60   : > { %p990_p13 = por %p989_p12, %p988_p11 }
  0x62   : > { %p991_p0 = pnand %p990_p13, %p986_p10 }
  0x64   : > { %994 = shalt.err (!%p991_p0)  }
  0x65   : > { %s1433_s7 = sld [smem:[#allocation51_spill]]  ;;  %s313_s28 = sadd.s32 6, %s1270_s16 }
  0x66   : > { %s1007_s12 = sshra.s32 %s308_s13, 4  ;;  %s1008_s12 = int_to_ptr.hbm [resolvable:$true] %s1007_s12 }
  0x67   : > { %s1009_s26 = scalar_lea.hbm %s1008_s12, 1  ;;  %p1012_p2 = scmp.lt.s32.totalorder %s1008_s12, %s1416_s1 }
  0x68   : > { %p1010_p1 = scmp.ne.s32.totalorder %s1008_s12, %s1009_s26  ;;  %p1013_p3 = scmp.lt.s32.totalorder %s1290_s30, %s1009_s26 }
  0x6a   : > { %p1014_p5 = por %p1013_p3, %p1012_p2 }
  0x6b   : > { %s1434_s27 = int_to_ptr.vmem [resolvable:$true] %s1433_s7 }
  0x6c   : > { %295 = dma.hbm_to_vmem [thread:$0]  %s291_s11, 16, %s1434_s27, [#allocation3] }
  0x6d   : > { %p1015_p6 = pnand %p1014_p5, %p1010_p1 }
  0x6f   : > { %1018 = shalt.err (!%p1015_p6)  }
  0x70   : > { %312 = dma.hbm_to_vmem [thread:$0]  %s308_s13, 16, %s310_s14, [#allocation3] }
  0x71   : > { %s314_s20 = sld [smem:[#allocation5 + %s313_s28]]  ;;  %s330_s11 = sadd.s32 7, %s1270_s16 }
  0x72   : > { %s331_s10 = sld [smem:[#allocation5 + %s330_s11]]  ;;  %s1175_s2 = smov [#allocation2 + $0x6]  }
  0x73   : > { %s326_s9 = sshll.u32 %s1175_s2, 4  ;;  %s1176_s15 = smov [#allocation2 + $0x7]   ;;  %s327_s9 = int_to_ptr.vmem [resolvable:$true] %s326_s9 }
  0x74   : > { %s1349_s18 = sshll.u32 %s1176_s15, 4  ;;  %s344_s18 = int_to_ptr.vmem [resolvable:$true] %s1349_s18 }
  0x77   : > { %s315_s27 = scalar_lea.hbm %s1416_s1, %s314_s20 }
  0x78   : > { %s324_s12 = sshll.u32 %s315_s27, 4  ;;  %s332_s16 = scalar_lea.hbm %s1416_s1, %s331_s10  ;;  %s325_s12 = int_to_ptr.hbm [resolvable:$true] %s324_s12 }
  0x79   : > { %s1031_s13 = sshra.s32 %s325_s12, 4  ;;  %s1032_s13 = int_to_ptr.hbm [resolvable:$true] %s1031_s13 }
  0x7a   : > { %s1033_s28 = scalar_lea.hbm %s1032_s13, 1  ;;  %p1036_p9 = scmp.lt.s32.totalorder %s1032_s13, %s1416_s1 }
  0x7b   : > { %p1034_p7 = scmp.ne.s32.totalorder %s1032_s13, %s1033_s28  ;;  %p1037_p10 = scmp.lt.s32.totalorder %s1290_s30, %s1033_s28 }
  0x7d   : > { %p1038_p11 = por %p1037_p10, %p1036_p9 }
  0x7f   : > { %p1039_p12 = pnand %p1038_p11, %p1034_p7 }
  0x81   : > { %1042 = shalt.err (!%p1039_p12)  }
  0x82   : > { %329 = dma.hbm_to_vmem [thread:$0]  %s325_s12, 16, %s327_s9, [#allocation3] }
  0x83   : > { %s341_s20 = sshll.u32 %s332_s16, 4  ;;  %s342_s20 = int_to_ptr.hbm [resolvable:$true] %s341_s20 }
  0x84   : > { %s1055_s11 = sshra.s32 %s342_s20, 4  ;;  %s1056_s11 = int_to_ptr.hbm [resolvable:$true] %s1055_s11 }
  0x85   : > { %s1057_s2 = scalar_lea.hbm %s1056_s11, 1  ;;  %p1060_p0 = scmp.lt.s32.totalorder %s1056_s11, %s1416_s1 }
  0x86   : > { %p1058_p13 = scmp.ne.s32.totalorder %s1056_s11, %s1057_s2  ;;  %p1061_p1 = scmp.lt.s32.totalorder %s1290_s30, %s1057_s2 }
  0x88   : > { %p1062_p2 = por %p1061_p1, %p1060_p0 }
  0x8a   : > { %p1063_p3 = pnand %p1062_p2, %p1058_p13 }
  0x8c   : > { %1066 = shalt.err (!%p1063_p3)  }
  0x8d   : > { %346 = dma.hbm_to_vmem [thread:$0]  %s342_s20, 16, %s344_s18, [#allocation3] }
  0x8e   : > { %s194_s29 = scalar_lea.vmem [#allocation9], %s1274_s17 }
  0x8f   : > { %1137 = dma.done.wait [#allocation3], 128 }
  0x90   : > { %1138 = vsyncadd [#allocation3], 4294967168  ;;  %v560_v0 = vld [vmem:[#allocation2] sm:$0xff]  ;;  %v561_v1 = vld [vmem:[#allocation6] sm:$0xff]  ;;  %s761_s30 = sshll.u32 %s1157_s25, 3  ;;  %s608_s25 = sshll.u32 %s194_s29, 4  ;;  %s609_s25 = int_to_ptr.vmem [resolvable:$true] %s608_s25 }
  0x91   : > { %v562_v2 = vadd.f32 %v561_v1, %v560_v0  ;;  %v841_v15 = vld [vmem:[%s1418_s3] ss:$0 sm:$0xff]  ;;  %s606_s12 = scalar_lea.hbm %s1420_s5, %s761_s30  ;;  %s1435_s13 = sand.u32 1, %s1149_s23  }
  0x92   : > { %v842_v19 = vld [vmem:[%s1419_s4] ss:$0 sm:$0xff]  ;;  %s610_s16 = sshll.u32 %s606_s12, 4  ;;  %s595_s28 = scalar_lea.sflag [#allocation8], %s1435_s13  ;;  %s611_s16 = int_to_ptr.hbm [resolvable:$true] %s610_s16 }
  0x93   : > { %563 = vadd.xlane.f32.xlu0 %v562_v2  ;;  %s1093_s19 = sshra.s32 %s611_s16, 4  ;;  %s1099_s2 = scalar_lea.hbm %s1420_s5, 16  ;;  %s1094_s19 = int_to_ptr.hbm [resolvable:$true] %s1093_s19 }
  0x94   : > { %s1095_s21 = scalar_lea.hbm %s1094_s19, 8  ;;  %p1100_p9 = scmp.lt.s32.totalorder %s1094_s19, %s1420_s5 }
  0x95   : > { %p1096_p5 = scmp.ne.s32.totalorder %s1094_s19, %s1095_s21  ;;  %p1101_p10 = scmp.lt.s32.totalorder %s1099_s2, %s1095_s21 }
  0x97   : > { %p1097_p6 = pnand %p1096_p5, %p1250_p4  ;;  %p1102_p11 = por %p1101_p10, %p1100_p9 }
  0x99   : > { %p1098_p7 = pneg %p1097_p6 }
  0x9b   : > { %p1103_p12 = pnand %p1102_p11, %p1098_p7 }
 0x106   : > { %v564_v3 = vpop.xlane.xlu0 %563 }
 0x107   : > { %v565_v4 = vmul.f32 0.0078125, %v564_v3 }
 0x109   : > { %v566_v5 = vsub.f32 %v562_v2, %v565_v4 }
 0x10b   : > { %v567_v6 = vmul.f32 %v566_v5, %v566_v5 }
 0x10d   : > { %568 = vadd.xlane.f32.xlu0 %v567_v6 }
 0x180   : > { %v569_v7 = vpop.xlane.xlu0 %568 }
 0x181   : > { %v570_v8 = vmul.f32 0.0078125, %v569_v7 }
 0x183   : > { %v571_v9 = vadd.f32 1e-12, %v570_v8 }
 0x185   : > { %843 = vrsqrt.f32 %v571_v9  ;;  %vm578_vm1 = vweird.f32 %v571_v9 }
 0x18b   : > { %v844_v10 = vpop.eup %843 }
 0x18c   : > { %v573_v11 = vmul.f32 %v844_v10, %v571_v9  ;;  %vm579_vm0 = vweird.f32 %v844_v10 }
 0x18d   : > { %vm580_vm2 = vmor %vm578_vm1, %vm579_vm0 }
 0x18e   : > { %v574_v12 = vmul.f32 %v844_v10, %v573_v11 }
 0x190   : > { %v575_v13 = vmul.f32 0.5, %v574_v12 }
 0x192   : > { %v576_v14 = vsub.f32 1.5, %v575_v13 }
 0x194   : > { %v577_v16 = vmul.f32 %v844_v10, %v576_v14 }
 0x196   : > { %v581_v17 = vsel %vm580_vm2, %v844_v10, %v577_v16 }
 0x197   : > { %v586_v18 = vmul.f32 %v841_v15, %v581_v17 }
 0x199   : > { %v587_v20 = vmul.f32 %v586_v18, %v566_v5 }
 0x19b   : > { %v592_v21 = vadd.f32 %v842_v19, %v587_v20 }
 0x19d   : > { %593 = vst [vmem:[%s194_s29] sm:$0xff] %v592_v21 }
 0x19e   : > { %1106 = shalt.err (!%p1103_p12)
}
 0x19f   : > { %770 = dma.vmem_to_hbm [thread:$0]  (%p1250_p4), %s609_s25, 128, %s611_s16, %s595_s28  }
 0x1a0 PF: > { %p782_p13 = scmp.ge.s32.totalorder %s1165_s0, 2  ;;  %s622_s17 = sand.u32 1, %s1145_s22  }
 0x1a1   : > { %s623_s29 = scalar_lea.sflag [#allocation8], %s622_s17 }
 0x1a2   : > { %p777_p0 = pnand %p782_p13, %p1257_p8 }
 0x1a4   : > { %p778_p1 = pneg %p777_p0 }
 0x1a6   : > { %1140 = dma.done.wait (%p778_p1), %s623_s29, 128  }
 0x1a7   : > { %1142 = vsyncadd (%p778_p1), %s623_s29, 4294967168  ;;  %s27_s0 = sadd.s32 1, %s1165_s0   ;;  %s1436_s30 = sld [smem:[#allocation50_spill]] }
 0x1a8   : > { %p24_p2 = scmp.ge.s32.totalorder %s27_s0, 4   ;;  %s1437_s25 = sld [smem:[#allocation48_spill]] }
 0x1a9   : > { %s1438_s26 = sld [smem:[#allocation49_spill]]  ;;  %s1439_s22 = smov %s1149_s23 }
 0x1aa   : > { %s1440_s23 = smov %s1153_s24  ;;  %26 = sbr.rel (!%p24_p2) target bundleno = 11 (0xb), region = 177 }
 0x1ad   : > { %s1441_s24 = smov %s1436_s30 }
 0x1af   :  { %629 = vsyncpa [#allocation7], 1 }
 0x1b0   :  { %631 = vsyncpa [#allocation7 + $0x1], 1 }
 0x1b1   :  { %632 = vsyncpa [#allocation8], 1 }
 0x1b2   :  { %634 = vsyncpa [#allocation8 + $0x1], 1 }
 0x1b3   :  { %635 = vsyncmov [#allocation3] }
 0x1b6   :  { %s636_s6 = vpop.sfrf %635 }
 0x1b7   :  { %p764_p4 = scmp.ne.s32.totalorder %s636_s6, 0 }
 0x1b9   :  { %640 = shalt.err (%p764_p4)  }
 0x1ba   :  { %642 = vsyncmov [#allocation3 + $0x1] }
 0x1bd   :  { %s643_s8 = vpop.sfrf %642 }
 0x1be   :  { %p765_p8 = scmp.ne.s32.totalorder %s643_s8, 0 }
 0x1c0   :  { %647 = shalt.err (%p765_p8)  }

</bundles_post_ra>
